<compile_context>
chip_gen: v7x
topology: tpu7x:2x2x1
jax: 0.10.0
libtpu: 0.0.40
codegen_flags: <defaults>
</compile_context>

<pallas_src>
import functools

import jax
import jax.numpy as jnp
from jax.experimental import pallas as pl
from jax.experimental.pallas import tpu as pltpu


# ---------------------------------------------------------------------------
# kernels
# ---------------------------------------------------------------------------
def _fused_se_kernel(x_ref, w1t_ref, b1_ref, w2t_ref, b2_ref, o_ref, *, inv_hw):
    # x_ref: (Bt, C, HW)  w1t: (C, Cr)  b1: (1, Cr)  w2t: (Cr, C)  b2: (1, C)
    x = x_ref[...]
    mean = jnp.sum(x.astype(jnp.float32), axis=-1) * inv_hw          # (Bt, C)
    # fc1 (1x1 conv) + HSwish: h * relu6(h + 3) / 6
    h = jnp.dot(mean, w1t_ref[...],
                preferred_element_type=jnp.float32) + b1_ref[...]    # (Bt, Cr)
    h = h * jnp.clip(h + 3.0, 0.0, 6.0) * (1.0 / 6.0)
    # fc2 (1x1 conv) + sigmoid
    s = jnp.dot(h, w2t_ref[...],
                preferred_element_type=jnp.float32) + b2_ref[...]    # (Bt, C)
    s = jax.nn.sigmoid(s)
    # excite: multiply in the input dtype (no full-tile f32 round-trip).
    o_ref[...] = (x * s.astype(x.dtype)[:, :, None]).astype(o_ref.dtype)


def _rowsum_kernel(x_ref, sum_ref, acc_ref, *, hw, thw, mask_tail):
    # x_ref: (Rt, THW)   sum_ref/acc_ref: (Rt, 1) f32
    h = pl.program_id(1)

    @pl.when(h == 0)
    def _():
        acc_ref[...] = jnp.zeros_like(acc_ref)

    x = x_ref[...].astype(jnp.float32)
    if mask_tail:  # static: only when THW does not divide HW (cdiv tail tile)
        col = h * thw + jax.lax.broadcasted_iota(jnp.int32, x.shape, 1)
        x = jnp.where(col < hw, x, 0.0)
    acc_ref[...] += jnp.sum(x, axis=-1, keepdims=True)

    @pl.when(h == pl.num_programs(1) - 1)
    def _():
        sum_ref[...] = acc_ref[...]


def _excite_kernel(x_ref, s_ref, o_ref):
    # x_ref: (Rt, THW)   s_ref: (Rt, 1) f32
    o_ref[...] = (x_ref[...] * s_ref[...].astype(x_ref.dtype)).astype(o_ref.dtype)


# ---------------------------------------------------------------------------
# tiling helpers
# ---------------------------------------------------------------------------
def _pick_last_dim_tile(n, cap_elems):
    """Lane-dim tile: a 128-multiple <= cap, or the full extent n."""
    cap = max(128, (cap_elems // 128) * 128)
    if n <= cap:
        return n                        # full-extent block (exempt from 128 rule)
    best = None
    t = 128
    while t <= cap:
        if n % t == 0:
            best = t
        t += 128
    return best if best is not None else cap   # cap -> cdiv grid, masked tail


def _pick_rows_tile(n, cap_elems):
    """Sublane-dim tile: an 8-multiple <= cap, or the full extent n."""
    cap = max(8, (cap_elems // 8) * 8)
    if n <= cap:
        return n
    best = None
    t = 8
    while t <= cap:
        if n % t == 0:
            best = t
        t += 8
    return best if best is not None else cap


def _largest_divisor_leq(n, cap):
    cap = max(1, min(n, cap))
    for d in range(cap, 0, -1):
        if n % d == 0:
            return d
    return 1


def _vmem_limit(need_bytes):
    # Always >= the computed need; stays well under v7x's 64 MiB physical VMEM.
    return int(min(max(need_bytes + (4 << 20), 32 << 20), 56 << 20))


# ---------------------------------------------------------------------------
# wrapper
# ---------------------------------------------------------------------------
def se_block(x, w1, b1, w2, b2, *,
             fused_x_budget_bytes=40 << 20,
             squeeze_tile_bytes=8 << 20,
             excite_tile_bytes=6 << 20):
    """x: (B, C, H, W); w1: (Cr, C); b1: (Cr,); w2: (C, Cr); b2: (C,)."""
    B, C, H, W = x.shape
    Cr = w1.shape[0]
    HW = H * W
    R = B * C
    itemsize = jnp.dtype(x.dtype).itemsize
    f32_extra = 4 if itemsize < 4 else 0   # in-kernel f32 transient for sub-f32 x

    # ------------------- fused single-pass fast path -------------------------
    w_bytes = 2 * (2 * C * Cr + C + Cr) * 4            # double-buffered weights
    per_row = C * HW * (4 * itemsize + f32_extra)      # in+out dbl-buffered (+f32 sum)
    avail = fused_x_budget_bytes - w_bytes - (1 << 20)
    bt_cap = (avail // per_row) if per_row > 0 else 0

    if bt_cap >= 1:
        if B >= 2:
            bt_cap = min(bt_cap, (B + 1) // 2)   # >=2 grid steps on the parallel axis
        Bt = _largest_divisor_leq(B, bt_cap)
        x3 = x.reshape(B, C, HW)                 # contiguous reshape (free)
        w1t = jnp.transpose(w1).astype(jnp.float32)   # (C, Cr)
        w2t = jnp.transpose(w2).astype(jnp.float32)   # (Cr, C)
        b1r = b1.reshape(1, Cr).astype(jnp.float32)
        b2r = b2.reshape(1, C).astype(jnp.float32)
        need = Bt * per_row + w_bytes
        cost = pl.CostEstimate(
            flops=int(2 * B * C * HW + 4 * B * C * Cr),
            transcendentals=int(B * (C + Cr)),
            bytes_accessed=int(2 * B * C * HW * itemsize + (2 * C * Cr + C + Cr) * 4),
        )
        out3 = pl.pallas_call(
            functools.partial(_fused_se_kernel, inv_hw=1.0 / HW),
            out_shape=jax.ShapeDtypeStruct((B, C, HW), x.dtype),
            grid_spec=pltpu.PrefetchScalarGridSpec(
                num_scalar_prefetch=0,
                grid=(B // Bt,),
                in_specs=[
                    pl.BlockSpec((Bt, C, HW), lambda b: (b, 0, 0)),   # x
                    pl.BlockSpec((C, Cr), lambda b: (0, 0)),          # w1^T
                    pl.BlockSpec((1, Cr), lambda b: (0, 0)),          # b1
                    pl.BlockSpec((Cr, C), lambda b: (0, 0)),          # w2^T
                    pl.BlockSpec((1, C), lambda b: (0, 0)),           # b2
                ],
                out_specs=pl.BlockSpec((Bt, C, HW), lambda b: (b, 0, 0)),
            ),
            compiler_params=pltpu.CompilerParams(
                dimension_semantics=("parallel",),
                vmem_limit_bytes=_vmem_limit(need)),
            cost_estimate=cost,
        )(x3, w1t, b1r, w2t, b2r)
        return out3.reshape(B, C, H, W)

    # ------------------- two-phase fallback (huge feature maps) --------------
    x2d = x.reshape(R, HW)                       # lane-dense slab, free reshape

    # Phase 1: per-row spatial sums (pure bandwidth streamer, no padding of x).
    t1_elems = max(1024, squeeze_tile_bytes // itemsize)
    THW1 = _pick_last_dim_tile(HW, max(128, t1_elems // 8))
    Rt1 = _pick_rows_tile(R, max(8, t1_elems // THW1))
    mask1 = (HW % THW1) != 0
    grid1 = (pl.cdiv(R, Rt1), pl.cdiv(HW, THW1))
    need1 = Rt1 * THW1 * (2 * itemsize + 4) + 4 * Rt1 * 4
    cost1 = pl.CostEstimate(flops=int(R * HW), transcendentals=0,
                            bytes_accessed=int(R * HW * itemsize + R * 4))
    sums = pl.pallas_call(
        functools.partial(_rowsum_kernel, hw=HW, thw=THW1, mask_tail=mask1),
        out_shape=jax.ShapeDtypeStruct((R, 1), jnp.float32),
        grid_spec=pltpu.PrefetchScalarGridSpec(
            num_scalar_prefetch=0,
            grid=grid1,
            in_specs=[pl.BlockSpec((Rt1, THW1), lambda r, h: (r, h))],
            out_specs=pl.BlockSpec((Rt1, 1), lambda r, h: (r, 0)),
            scratch_shapes=[pltpu.VMEM((Rt1, 1), jnp.float32)],
        ),
        compiler_params=pltpu.CompilerParams(
            dimension_semantics=("parallel", "arbitrary"),
            vmem_limit_bytes=_vmem_limit(need1)),
        cost_estimate=cost1,
    )(x2d)

    # Tiny FC1/hswish/FC2/sigmoid on the (B, C) means: negligible, plain XLA.
    mean = sums.reshape(B, C) * jnp.float32(1.0 / HW)
    hmid = mean @ jnp.transpose(w1).astype(jnp.float32) + b1.astype(jnp.float32)
    hmid = hmid * jnp.clip(hmid + 3.0, 0.0, 6.0) * (1.0 / 6.0)
    s = jax.nn.sigmoid(hmid @ jnp.transpose(w2).astype(jnp.float32)
                       + b2.astype(jnp.float32))                      # (B, C)
    s_rows = s.reshape(R, 1)

    # Phase 2: excite (lane-dense streaming multiply, masked-tail writes).
    t2_elems = max(1024, excite_tile_bytes // itemsize)
    THW2 = _pick_last_dim_tile(HW, max(128, t2_elems // 8))
    Rt2 = _pick_rows_tile(R, max(8, t2_elems // THW2))
    grid2 = (pl.cdiv(R, Rt2), pl.cdiv(HW, THW2))
    need2 = 5 * Rt2 * THW2 * itemsize + 4 * Rt2 * 4
    cost2 = pl.CostEstimate(flops=int(R * HW), transcendentals=0,
                            bytes_accessed=int(2 * R * HW * itemsize + R * 4))
    out2d = pl.pallas_call(
        _excite_kernel,
        out_shape=jax.ShapeDtypeStruct((R, HW), x.dtype),
        grid_spec=pltpu.PrefetchScalarGridSpec(
            num_scalar_prefetch=0,
            grid=grid2,
            in_specs=[
                pl.BlockSpec((Rt2, THW2), lambda r, h: (r, h)),   # x rows
                pl.BlockSpec((Rt2, 1), lambda r, h: (r, 0)),      # per-row scale
            ],
            out_specs=pl.BlockSpec((Rt2, THW2), lambda r, h: (r, h)),
        ),
        compiler_params=pltpu.CompilerParams(
            dimension_semantics=("parallel", "parallel"),
            vmem_limit_bytes=_vmem_limit(need2)),
        cost_estimate=cost2,
    )(x2d, s_rows)
    return out2d.reshape(B, C, H, W)


# ---------------------------------------------------------------------------
# pure-JAX reference (matches the PyTorch forward)
# ---------------------------------------------------------------------------
def se_block_ref(x, w1, b1, w2, b2):
    y = jnp.mean(x, axis=(2, 3), keepdims=True)                       # (B,C,1,1)
    y = jnp.einsum('bcij,rc->brij', y, w1) + b1[None, :, None, None]  # fc1
    y = y * jnp.clip(y + 3.0, 0.0, 6.0) / 6.0                         # hswish
    y = jnp.einsum('brij,cr->bcij', y, w2) + b2[None, :, None, None]  # fc2
    y = jax.nn.sigmoid(y)
    return x * y


if __name__ == "__main__":
    def make_inputs(B, C, H, W, reduction=4):
        Cr = max(1, C // reduction)
        ks = jax.random.split(jax.random.PRNGKey(0), 5)
        x = jax.random.normal(ks[0], (B, C, H, W), dtype=jnp.float32)
        w1 = 0.5 * jax.random.normal(ks[1], (Cr, C), dtype=jnp.float32)
        b1 = 0.1 * jax.random.normal(ks[2], (Cr,), dtype=jnp.float32)
        w2 = 0.5 * jax.random.normal(ks[3], (C, Cr), dtype=jnp.float32)
        b2 = 0.1 * jax.random.normal(ks[4], (C,), dtype=jnp.float32)
        return x, w1, b1, w2, b2

    # 1) primary shape — fused single-pass path
    x, w1, b1, w2, b2 = make_inputs(2, 4, 16, 16)
    ref = jax.block_until_ready(se_block_ref(x, w1, b1, w2, b2))
    out = jax.block_until_ready(se_block(x, w1, b1, w2, b2))
    assert out.shape == x.shape
    assert jnp.allclose(out, ref, atol=1e-5, rtol=1e-5), (
        f"fused path max abs err {jnp.max(jnp.abs(out - ref))}")

    # 2) same shape, two-phase path forced (exercises the streaming kernels)
    out2 = jax.block_until_ready(se_block(x, w1, b1, w2, b2,
                                          fused_x_budget_bytes=0))
    assert jnp.allclose(out2, ref, atol=1e-5, rtol=1e-5), (
        f"two-phase path max abs err {jnp.max(jnp.abs(out2 - ref))}")

    # 3) non-128-aligned spatial size: fused path (full-extent HW block) and
    #    two-phase path with tiny tiles (masked tail tiles / masked writes)
    xb, w1b, b1b, w2b, b2b = make_inputs(2, 4, 9, 37)
    refb = jax.block_until_ready(se_block_ref(xb, w1b, b1b, w2b, b2b))
    outb = jax.block_until_ready(se_block(xb, w1b, b1b, w2b, b2b))
    assert jnp.allclose(outb, refb, atol=1e-5, rtol=1e-5), (
        f"fused unaligned max abs err {jnp.max(jnp.abs(outb - refb))}")
    outc = jax.block_until_ready(
        se_block(xb, w1b, b1b, w2b, b2b, fused_x_budget_bytes=0,
                 squeeze_tile_bytes=4096, excite_tile_bytes=4096))
    assert jnp.allclose(outc, refb, atol=1e-5, rtol=1e-5), (
        f"two-phase unaligned max abs err {jnp.max(jnp.abs(outc - refb))}")

    print("KERNEL_OK")
</pallas_src>

<mosaic_0001>
module attributes {stable_mosaic.version = 11 : i64} {
  func.func @_fused_se_kernel(%arg0: i32, %arg1: memref<1x4x256xf32, #tpu.memory_space<vmem>>, %arg2: memref<4x1xf32, #tpu.memory_space<vmem>>, %arg3: memref<1x1xf32, #tpu.memory_space<vmem>>, %arg4: memref<1x4xf32, #tpu.memory_space<vmem>>, %arg5: memref<1x4xf32, #tpu.memory_space<vmem>>, %arg6: memref<1x4x256xf32, #tpu.memory_space<vmem>>) attributes {dimension_semantics = [#tpu.dimension_semantics<parallel>], iteration_bounds = array<i64: 2>, scalar_prefetch = 0 : i64, scratch_operands = 0 : i64, tpu.core_type = #tpu.core_type<tc>, window_params = [{transform_indices = @transform_0, window_bounds = array<i64: 1, 4, 256>}, {pipeline_mode = #tpu.pipeline_mode<synchronous>, transform_indices = @transform_1, window_bounds = array<i64: 4, 1>}, {pipeline_mode = #tpu.pipeline_mode<synchronous>, transform_indices = @transform_2, window_bounds = array<i64: 1, 1>}, {pipeline_mode = #tpu.pipeline_mode<synchronous>, transform_indices = @transform_3, window_bounds = array<i64: 1, 4>}, {pipeline_mode = #tpu.pipeline_mode<synchronous>, transform_indices = @transform_4, window_bounds = array<i64: 1, 4>}, {transform_indices = @transform_5, window_bounds = array<i64: 1, 4, 256>}]} {
    %c0 = arith.constant 0 : index
    %c0_0 = arith.constant 0 : index
    %c0_1 = arith.constant 0 : index
    %0 = vector.load %arg1[%c0, %c0_0, %c0_1] : memref<1x4x256xf32, #tpu.memory_space<vmem>>, vector<1x4x256xf32>
    %cst = arith.constant dense<0.000000e+00> : vector<1x4xf32>
    %1 = vector.multi_reduction <add>, %0, %cst [2] : vector<1x4x256xf32> to vector<1x4xf32>
    %cst_2 = arith.constant 3.906250e-03 : f32
    %2 = vector.broadcast %cst_2 : f32 to vector<1x4xf32>
    %3 = arith.mulf %1, %2 : vector<1x4xf32>
    %c0_3 = arith.constant 0 : index
    %c0_4 = arith.constant 0 : index
    %4 = vector.load %arg2[%c0_3, %c0_4] : memref<4x1xf32, #tpu.memory_space<vmem>>, vector<4x1xf32>
    %cst_5 = arith.constant dense<0.000000e+00> : vector<1x1xf32>
    %5 = tpu.matmul %3, %4, %cst_5 {dimension_numbers = #tpu.dot_dimension_numbers<[1], [0], [0], [1], [0, 0, 1, 1], [], []>} : vector<1x4xf32>, vector<4x1xf32>, vector<1x1xf32> -> vector<1x1xf32>
    %c0_6 = arith.constant 0 : index
    %c0_7 = arith.constant 0 : index
    %6 = vector.load %arg3[%c0_6, %c0_7] : memref<1x1xf32, #tpu.memory_space<vmem>>, vector<1x1xf32>
    %7 = arith.addf %5, %6 : vector<1x1xf32>
    %cst_8 = arith.constant 3.000000e+00 : f32
    %8 = vector.broadcast %cst_8 : f32 to vector<1x1xf32>
    %9 = arith.addf %7, %8 : vector<1x1xf32>
    %cst_9 = arith.constant 0.000000e+00 : f32
    %cst_10 = arith.constant 6.000000e+00 : f32
    %10 = vector.broadcast %cst_9 : f32 to vector<1x1xf32>
    %11 = arith.maximumf %10, %9 : vector<1x1xf32>
    %12 = vector.broadcast %cst_10 : f32 to vector<1x1xf32>
    %13 = arith.minimumf %12, %11 : vector<1x1xf32>
    %14 = arith.mulf %7, %13 : vector<1x1xf32>
    %cst_11 = arith.constant 0.166666672 : f32
    %15 = vector.broadcast %cst_11 : f32 to vector<1x1xf32>
    %16 = arith.mulf %14, %15 : vector<1x1xf32>
    %c0_12 = arith.constant 0 : index
    %c0_13 = arith.constant 0 : index
    %17 = vector.load %arg4[%c0_12, %c0_13] : memref<1x4xf32, #tpu.memory_space<vmem>>, vector<1x4xf32>
    %cst_14 = arith.constant dense<0.000000e+00> : vector<1x4xf32>
    %18 = tpu.matmul %16, %17, %cst_14 {dimension_numbers = #tpu.dot_dimension_numbers<[1], [0], [0], [1], [0, 0, 1, 1], [], []>} : vector<1x1xf32>, vector<1x4xf32>, vector<1x4xf32> -> vector<1x4xf32>
    %c0_15 = arith.constant 0 : index
    %c0_16 = arith.constant 0 : index
    %19 = vector.load %arg5[%c0_15, %c0_16] : memref<1x4xf32, #tpu.memory_space<vmem>>, vector<1x4xf32>
    %20 = arith.addf %18, %19 : vector<1x4xf32>
    %21 = arith.negf %20 : vector<1x4xf32>
    %22 = math.exp %21 : vector<1x4xf32>
    %cst_17 = arith.constant 1.000000e+00 : f32
    %23 = vector.broadcast %cst_17 : f32 to vector<1x4xf32>
    %24 = arith.addf %23, %22 : vector<1x4xf32>
    %25 = arith.divf %23, %24 : vector<1x4xf32>
    %26 = vector.shape_cast %25 : vector<1x4xf32> to vector<1x4x1xf32>
    %27 = vector.broadcast %26 : vector<1x4x1xf32> to vector<1x4x256xf32>
    %28 = arith.mulf %0, %27 : vector<1x4x256xf32>
    %c0_18 = arith.constant 0 : index
    %c0_19 = arith.constant 0 : index
    %c0_20 = arith.constant 0 : index
    %29 = vector.load %arg6[%c0_18, %c0_19, %c0_20] : memref<1x4x256xf32, #tpu.memory_space<vmem>>, vector<1x4x256xf32>
    tpu.vector_store %arg6[%c0_18, %c0_19, %c0_20], %28 {strides = array<i32>} : memref<1x4x256xf32, #tpu.memory_space<vmem>>, vector<1x4x256xf32>,
    return
  }
  func.func @transform_0(%arg0: i32) -> (i32, i32, i32) {
    %c0_i32 = arith.constant 0 : i32
    %c0_i32_0 = arith.constant 0 : i32
    %c0_i32_1 = arith.constant 0 : i32
    return %arg0, %c0_i32, %c0_i32_0 : i32, i32, i32
  }
  func.func @transform_1(%arg0: i32) -> (i32, i32) {
    %c0_i32 = arith.constant 0 : i32
    %c0_i32_0 = arith.constant 0 : i32
    %c0_i32_1 = arith.constant 0 : i32
    return %c0_i32, %c0_i32_0 : i32, i32
  }
  func.func @transform_2(%arg0: i32) -> (i32, i32) {
    %c0_i32 = arith.constant 0 : i32
    %c0_i32_0 = arith.constant 0 : i32
    %c0_i32_1 = arith.constant 0 : i32
    return %c0_i32, %c0_i32_0 : i32, i32
  }
  func.func @transform_3(%arg0: i32) -> (i32, i32) {
    %c0_i32 = arith.constant 0 : i32
    %c0_i32_0 = arith.constant 0 : i32
    %c0_i32_1 = arith.constant 0 : i32
    return %c0_i32, %c0_i32_0 : i32, i32
  }
  func.func @transform_4(%arg0: i32) -> (i32, i32) {
    %c0_i32 = arith.constant 0 : i32
    %c0_i32_0 = arith.constant 0 : i32
    %c0_i32_1 = arith.constant 0 : i32
    return %c0_i32, %c0_i32_0 : i32, i32
  }
  func.func @transform_5(%arg0: i32) -> (i32, i32, i32) {
    %c0_i32 = arith.constant 0 : i32
    %c0_i32_0 = arith.constant 0 : i32
    %c0_i32_1 = arith.constant 0 : i32
    return %arg0, %c0_i32, %c0_i32_0 : i32, i32, i32
  }
}

</mosaic_0001>

<bundles_post_ra>
// kernel: tpu_custom_call.1
= control target key start
LH: loop header
LB: loop body
LE: loop exit
PB: predicated region body
PF: predicated region fallthrough
CT: control target
= control target key end

     0   :  { %s932_s0 = inlined_call_operand.hbm [shape: f32[2,4,256], index: 0, kind: input, shape index: {}]   ;;  %s933_s1 = inlined_call_operand.vmem [shape: f32[4,1], index: 1, kind: input, shape index: {}]   ;;  %s934_s2 = inlined_call_operand.<no memory space> [shape: f32[1,1], index: 2, kind: input, shape index: {}]   ;;  %s935_s3 = inlined_call_operand.vmem [shape: f32[1,4], index: 3, kind: input, shape index: {}]   ;;  %s936_s4 = inlined_call_operand.vmem [shape: f32[1,4], index: 4, kind: input, shape index: {}]   ;;  %s937_s5 = inlined_call_operand.hbm [shape: f32[2,4,256], index: 5, kind: output, shape index: {}]  }
   0x1   :  { %v10_v0 = vstv %s934_s2 }
   0x2   :  { %11 = vst [vmem:[#allocation2] sm:$0x1] %v10_v0 }
   0x3   :  { %12 = vsyncpa [#allocation4], 0 }
   0x4   :  { %14 = vsyncpa [#allocation4 + $0x1], 0 }
   0x5   :  { %15 = vsyncpa [#allocation5], 0 }
   0x6   :  { %17 = vsyncpa [#allocation5 + $0x1], 0  ;;  %s758_s20 = smov 0   ;;  %s760_s21 = smov 0  }
   0x7   :  { %s762_s22 = smov 0   ;;  %s764_s23 = smov 0  }
   0x8 LB: > { %s779_s2 = sadd.s32 4294967295, %s718_s23   ;;  %s533_s24 = sadd.s32 4294967294, %s718_s23   ;;  %s718_s23 = sphi %s764_s23, %s952_s23   ;;  %s714_s22 = sphi %s762_s22, %s951_s22   ;;  %s710_s21 = sphi %s760_s21, %s950_s21   ;;  %s706_s20 = sphi %s758_s20, %s949_s20  }
   0x9   : > { %s783_s25 = sadd.s32 1, %s718_s23   ;;  %s30_s26 = sadd.s32 1, %s714_s22 }
   0xa   : > { %s27_s27 = ssub.s32 %s718_s23, %s783_s25  ;;  %p37_p0 = scmp.ne.s32.totalorder %s714_s22, %s710_s21 }
   0xb   : > { %p28_p1 = scmp.eq.s32.totalorder %s27_s27, 0  ;;  %p38_p2 = scmp.eq.s32.totalorder %s718_s23, 0 }
   0xc   : > { %p43_p3 = scmp.ne.s32.totalorder %s710_s21, %s706_s20  ;;  %p44_p4 = scmp.eq.s32.totalorder %s779_s2, 0 }
   0xd   : > { %s795_s28 = scalar_select %p28_p1, %s714_s22, %s30_s26  }
   0xe   : > { %p797_p5 = por %p38_p2, %p37_p0  ;;  %p801_p6 = por %p44_p4, %p43_p3 }
   0xf   : > { %p151_p7 = scmp.eq.s32.totalorder %s779_s2, 1  ;;  %p157_p8 = scmp.eq.s32.totalorder %s533_s24, 1 }
  0x10   : > { %p580_p10 = scmp.lt.s32.totalorder %s718_s23, 2  ;;  %s189_s8 = sand.u32 1, %s714_s22  }
  0x11   : > { %p808_p11 = por %p151_p7, %p37_p0  ;;  %p812_p12 = por %p157_p8, %p43_p3 }
  0x12   : > { %s552_s9 = sshll.u32 %s718_s23, 7  ;;  %s536_s10 = sshll.u32 %s189_s8, 3 }
  0x13   : > { %s941_s6 = scalar_select %p808_p11, 1, 0 }
  0x14   : > { %s942_s7 = scalar_select %p812_p12, 1, 0 }
  0x15   : > { %s821_s13 = scalar_lea.hbm %s932_s0, %s552_s9  ;;  %s193_s14 = scalar_lea.vmem [#allocation3], %s536_s10 }
  0x16   : > { %s201_s15 = sshll.u32 %s193_s14, 4  ;;  %p825_p13 = pnand %p580_p10, %p797_p5  ;;  %s829_s15 = int_to_ptr.vmem [resolvable:$true] %s201_s15 }
  0x17   : > { %s190_s17 = scalar_lea.sflag [#allocation4], %s189_s8  ;;  %s622_s18 = scalar_lea.hbm %s821_s13, 128 }
  0x18   : > { %p623_p2 = scmp.ne.s32.totalorder %s821_s13, %s622_s18  ;;  %p624_p3 = pneg %p825_p13 }
  0x19   : > { %s627_s26 = scalar_lea.hbm %s932_s0, 256  ;;  %p628_p5 = scmp.lt.u32.totalorder %s821_s13, %s932_s0 }
  0x1a   : > { %p625_p4 = pnand %p624_p3, %p623_p2  ;;  %p629_p8 = scmp.lt.u32.totalorder %s627_s26, %s622_s18 }
  0x1b   : > { %p631_p9 = scmp.lt.u32.totalorder %s622_s18, %s821_s13 }
  0x1c   : > { %p626_p7 = pneg %p625_p4  ;;  %p630_p10 = por %p629_p8, %p628_p5 }
  0x1e   : > { %p632_p0 = por %p631_p9, %p630_p10 }
  0x20   : > { %p633_p1 = pnand %p632_p0, %p626_p7 }
  0x22   : > { %636 = shalt.err (!%p633_p1)
}
  0x23   : > { %s637_s8 = scalar_lea.vmem %s829_s15, 128  ;;  %s720_s9 = smov [#allocation3]  }
  0x24   : > { %p638_p2 = scmp.ne.s32.totalorder %s829_s15, %s637_s8  ;;  %s642_s10 = sshll.u32 %s720_s9, 4  ;;  %s643_s10 = int_to_ptr.vmem [resolvable:$false] %s642_s10 }
  0x25   : > { %s644_s11 = scalar_lea.vmem %s643_s10, 256  ;;  %p645_p11 = scmp.lt.s32.totalorder %s829_s15, %s643_s10 }
  0x26   : > { %p640_p4 = pnand %p638_p2, %p624_p3  ;;  %p646_p5 = scmp.lt.s32.totalorder %s644_s11, %s637_s8 }
  0x28   : > { %p641_p12 = pneg %p640_p4  ;;  %p647_p8 = por %p646_p5, %p645_p11 }
  0x2a   : > { %p648_p9 = pnand %p647_p8, %p641_p12 }
  0x2c   : > { %651 = shalt.err (!%p648_p9)
}
  0x2d   : > { %575 = dma.hbm_to_vmem [thread:$0]  (!%p825_p13), %s821_s13, 128, %s829_s15, %s190_s17  }
  0x2e   : > { %p944_p0 = scmp.lt.s32.totalorder %s718_s23, 3  ;;  %p945_p1 = scmp.ge.s32.totalorder %s718_s23, 1 }
  0x30   : > { %p207_p3 = pnand %p945_p1, %p944_p0 }
  0x31   : > { %s863_s12 = sand.u32 (!%p207_p3), 1, %s710_s21  }
  0x32   : > { %210 = sbr.rel (%p207_p3) target bundleno = 809 (0x329), region = 40  ;;  %s540_s14 = sshll.u32 (!%p207_p3), %s863_s12, 3 }
  0x33   : > { %s213_s18 = scalar_lea.sflag (!%p207_p3), [#allocation4], %s863_s12  ;;  %s216_s16 = scalar_lea.vmem (!%p207_p3), [#allocation3], %s540_s14 }
  0x39   : > { %697 = dma.done.wait (%p801_p6), %s213_s18, 128  }
  0x3a   : > { %699 = vsyncadd (%p801_p6), %s213_s18, 4294967168  ;;  %vm247_vm0 = vcmask 1043456   ;;  %v243_v1 = vld [vmem:[%s216_s16] sm:$0xff]  ;;  %v721_v6 = vmov 0.0   ;;  %vm722_vm1 = vmmov 0   ;;  %v257_v8 = vlaneseq  ;;  %s553_s26 = sshll.u32 %s779_s2, 7 }
  0x3b   : > { %v245_v2 = vcombine.high %v243_v1, %v243_v1  ;;  %v248_v3 = vsel %vm247_vm0, %v243_v1, 0.0  ;;  %558 = vmatprep.subr.mxu0 %v721_v6  ;;  %v254_v7 = vld [vmem:[%s933_s1] sm:$0xf]  ;;  %563 = vmatprep.subr.mxu1 %v721_v6  ;;  %vm263_vm2 = vcmask 31744   ;;  %vm350_vm3 = vcmask 1040384   ;;  %s242_s27 = scalar_lea.vmem [#allocation6], %s540_s14  ;;  %s888_s10 = scalar_lea.hbm %s937_s5, %s553_s26 }
  0x3c   : > { %559 = vmatpush3.msk.msra.mxu0 %vm247_vm0, %v254_v7  ;;  %560 = vmatprep.mubr.msk.f32.mxu0 %vm722_vm1, %v721_v6  ;;  %v258_v9 = vand.u32 127, %v257_v8  ;;  %v260_v10 = vshrl.u32 %v257_v8, 7  ;;  %v344_v15 = vld [vmem:[%s935_s3] sm:$0x1]  ;;  %vm346_vm4 = vcmask 7168   ;;  %s463_s29 = sshll.u32 %s242_s27, 4  ;;  %s890_s29 = int_to_ptr.vmem [resolvable:$true] %s463_s29 }
  0x3d   : > { %v249_v4 = vsel %vm247_vm0, %v245_v2, 0.0  ;;  %565 = vmatprep.mubr.msk.f32.mxu1 %vm722_vm1, %v721_v6  ;;  %564 = vmatpush3.msk.msra.mxu1 %vm350_vm3, %v344_v15  ;;  %v255_v16 = vld [vmem:[#allocation2] sm:$0x1]  ;;  %v723_v35 = vmov 839922192   ;;  %s449_s11 = scalar_lea.sflag [#allocation5], %s863_s12 }
  0x3e   : > { %v250_v5 = vadd.f32 %v249_v4, %v248_v3  ;;  %v261_v11 = vsub.s32 %v258_v9, %v260_v10  ;;  %v345_v25 = vld [vmem:[%s936_s4] sm:$0x1]  ;;  %v432_v32 = vsub.s32 0, %v260_v10  ;;  %v439_v36 = vunpack.c.l.s4 %v723_v35  ;;  %s652_s18 = scalar_lea.vmem %s890_s29, 128  ;;  %p946_p11 = scmp.ne.s32.totalorder %s941_s6, 0 }
  0x3f   : > { %p653_p6 = scmp.ne.s32.totalorder %s890_s29, %s652_s18  ;;  %s724_s2 = smov [#allocation6]  }
  0x40   : > { %251 = vadd.xlane.f32.xlu0 %v250_v5  ;;  %v440_v37 = vunpack.c.0.s8 %v439_v36  ;;  %s656_s14 = sshll.u32 %s724_s2, 4  ;;  %s657_s14 = int_to_ptr.vmem [resolvable:$false] %s656_s14 }
  0x41   : > { %p654_p12 = pnand %p653_p6, %p946_p11  ;;  %s658_s16 = scalar_lea.vmem %s657_s14, 256 }
  0x42   : > { %v443_v38 = vsub.s32 %v440_v37, %v260_v10  ;;  %p659_p7 = scmp.lt.s32.totalorder %s890_s29, %s657_s14  ;;  %p660_p10 = scmp.lt.s32.totalorder %s658_s16, %s652_s18 }
  0x43   : > { %p655_p13 = pneg %p654_p12 }
  0x44   : > { %p661_p2 = por %p660_p10, %p659_p7 }
  0x46   : > { %p662_p4 = pnand %p661_p2, %p655_p13 }
  0xcd   : > { %v252_v12 = vpop.xlane.xlu0 %251 }
  0xce   : > { %v253_v13 = vmul.f32 0.00390625, %v252_v12 }
  0xd0   : > { %v262_v14 = vrot.slane %v253_v13, %v261_v11 }
  0xd2   : > { %561 = vmatmul.mubr.msk.f32.vlgmr.msra.gmra.mrb[0].mxu0 %vm263_vm2, %v262_v14 }
 0x1a5   : > { %v335_v17 = vpop.f32.mrb[0].mxu0 }
 0x1a6   : > { %v336_v18 = vadd.f32 %v335_v17, %v255_v16  ;;  %v562_v19 = vpop.f32.mrb[1].mxu0 }
 0x1a8   : > { %v339_v20 = vadd.f32 3.0, %v336_v18 }
 0x1aa   : > { %v340_v21 = vmax.f32 %v339_v20, 0.0 }
 0x1ac   : > { %v341_v22 = vmin.f32 %v340_v21, 6.0 }
 0x1ae   : > { %v342_v23 = vmul.f32 %v341_v22, %v336_v18 }
 0x1b0   : > { %v343_v24 = vmul.f32 0.16666667, %v342_v23 }
 0x1b2   : > { %566 = vmatmul.mubr.msk.f32.vlgmr.msra.gmra.mrb[0].mxu1 %vm346_vm4, %v343_v24 }
 0x285   : > { %v420_v26 = vpop.f32.mrb[0].mxu1 }
 0x286   : > { %v421_v27 = vadd.f32 %v420_v26, %v345_v25  ;;  %v567_v28 = vpop.f32.mrb[1].mxu1 }
 0x288   : > { %v546_v29 = vmul.f32 -1.442695, %v421_v27 }
 0x28a   : > { %618 = vpow2.f32 %v546_v29 }
 0x294   : > { %v619_v30 = vpop.eup %618 }
 0x295   : > { %v427_v31 = vadd.f32 1.0, %v619_v30 }
 0x297   : > { %620 = vrcp.f32 %v427_v31 }
 0x2a1   : > { %v621_v33 = vpop.eup %620 }
 0x2a2   : > { %v433_v34 = vrot.slane %v621_v33, %v432_v32 }
 0x2a4   : > { %435 = vbcast.lane.b32.xlu0 %v433_v34, 256 }
 0x316   : > { %v436_v39 = vpop.permute.xlu0 %435 }
 0x317   : > { %v444_v40 = vrot.slane %v436_v39, %v443_v38 }
 0x319   : > { %v446_v41 = vmul.f32 %v444_v40, %v243_v1 }
 0x31b   : > { %447 = vst [vmem:[%s242_s27] sm:$0xff] %v446_v41 }
 0x31c   : > { %665 = shalt.err (!%p662_p4)
}
 0x31d   : > { %s666_s12 = scalar_lea.hbm %s888_s10, 128  ;;  %s670_s30 = scalar_lea.hbm %s937_s5, 256 }
 0x31e   : > { %p667_p5 = scmp.ne.s32.totalorder %s888_s10, %s666_s12  ;;  %p671_p0 = scmp.lt.u32.totalorder %s888_s10, %s937_s5 }
 0x31f   : > { %p672_p1 = scmp.lt.u32.totalorder %s670_s30, %s666_s12  ;;  %p674_p6 = scmp.lt.u32.totalorder %s666_s12, %s888_s10 }
 0x320   : > { %p668_p8 = pnand %p667_p5, %p946_p11 }
 0x321   : > { %p673_p3 = por %p672_p1, %p671_p0 }
 0x322   : > { %p669_p9 = pneg %p668_p8 }
 0x323   : > { %p675_p12 = por %p674_p6, %p673_p3 }
 0x325   : > { %p676_p13 = pnand %p675_p12, %p669_p9 }
 0x327   : > { %679 = shalt.err (!%p676_p13)
}
 0x328   : > { %570 = dma.vmem_to_hbm [thread:$0]  (%p946_p11), %s890_s29, 128, %s888_s10, %s449_s11  }
 0x329 PF: > { %s475_s24 = sand.u32 1, %s706_s20   ;;  %p947_p7 = scmp.ne.s32.totalorder %s942_s7, 0 }
 0x32a   : > { %p948_p10 = scmp.ge.s32.totalorder %s718_s23, 2  ;;  %s476_s26 = scalar_lea.sflag [#allocation5], %s475_s24 }
 0x32c   : > { %p577_p2 = pnand %p948_p10, %p947_p7 }
 0x32e   : > { %701 = dma.done.wait (!%p577_p2), %s476_s26, 128  }
 0x32f   : > { %703 = vsyncadd (!%p577_p2), %s476_s26, 4294967168  ;;  %p20_p4 = scmp.ge.s32.totalorder %s783_s25, 4   ;;  %s949_s20 = smov %s710_s21 }
 0x330   : > { %s950_s21 = smov %s714_s22  ;;  %s951_s22 = smov %s795_s28 }
 0x331   : > { %s952_s23 = smov %s783_s25  ;;  %22 = sbr.rel (!%p20_p4) target bundleno = 8 (0x8), region = 85 }
 0x338   :  { %481 = vsyncpa [#allocation4], 1 }
 0x339   :  { %483 = vsyncpa [#allocation4 + $0x1], 1 }
 0x33a   :  { %484 = vsyncpa [#allocation5], 1 }
 0x33b   :  { %486 = vsyncpa [#allocation5 + $0x1], 1 }

</bundles_post_ra>
